<compile_context>
chip_gen: v5e
topology: v5e:2x2
jax: 0.10.0
libtpu: 0.0.40
codegen_flags: <defaults>
</compile_context>

<pallas_src>
import functools

import jax
import jax.numpy as jnp
from jax.experimental import pallas as pl
from jax.experimental.pallas import tpu as pltpu


def _gated_kernel(alpha, b_ref, w_ref, h_ref, x_ref, o_ref):
    # b_ref: SMEM (2,)  [bf, bu]
    # w_ref: VMEM (4, N) rows = [Wf_h, Wf_x, Wu_h, Wu_x]
    # h_ref, x_ref, o_ref: VMEM (TB, N)
    h = h_ref[...].astype(jnp.float32)
    x = x_ref[...].astype(jnp.float32)

    wf_h = w_ref[0:1, :].astype(jnp.float32)   # (1, N) broadcast over batch rows
    wf_x = w_ref[1:2, :].astype(jnp.float32)
    wu_h = w_ref[2:3, :].astype(jnp.float32)
    wu_x = w_ref[3:4, :].astype(jnp.float32)

    # Linear(concat([h, x])) == h @ Wf_h^T + x @ Wf_x^T  (VPU mul + XLU reduce)
    s_f = jnp.sum(h * wf_h + x * wf_x, axis=-1, keepdims=True) + b_ref[0]
    s_u = jnp.sum(h * wu_h + x * wu_x, axis=-1, keepdims=True) + b_ref[1]

    f = alpha * jnp.tanh(s_f)                  # (TB, 1), tanh -> EUP
    u = alpha * jnp.tanh(s_u)                  # (TB, 1)

    o_ref[...] = ((1.0 + f) * h + (1.0 + u) * x).astype(o_ref.dtype)


def _pick_block_rows(B, N, itemsize):
    """Largest batch tile whose double-buffered streams fit a conservative
    VMEM budget (safe for v5e's 16 MiB default scoped VMEM; v6e/v7x have more)."""
    budget = 12 * 1024 * 1024                       # bytes for pipelined blocks
    max_rows = max(1, budget // (3 * 2 * N * itemsize))  # h, x, out; 2 buffers
    tb = min(B, max_rows, 1024)
    if B > 8:
        tb = max(8, (tb // 8) * 8)                  # sublane-aligned tiles
    else:
        tb = B                                      # full-extent block is legal
    return tb


def gated_module(h, x, w_f, b_f, w_u, b_u, alpha=0.1):
    """h, x: (B, N). w_f, w_u: (1, 2N). b_f, b_u: (1,)."""
    B, N = h.shape
    assert x.shape == (B, N)
    assert w_f.shape == (1, 2 * N) and w_u.shape == (1, 2 * N)

    # (1, 2N) row-major split-at-N is exactly a reshape; fuse both gates.
    w4 = jnp.concatenate(
        [w_f.reshape(2, N), w_u.reshape(2, N)], axis=0)          # (4, N)
    b2 = jnp.concatenate(
        [b_f.reshape(1), b_u.reshape(1)], axis=0).astype(jnp.float32)  # (2,)

    tb = _pick_block_rows(B, N, h.dtype.itemsize)
    grid_b = pl.cdiv(B, tb)
    b_padded = grid_b * tb
    if b_padded != B:  # pad batch so every grid step sees a full tile
        pad = b_padded - B
        h = jnp.pad(h, ((0, pad), (0, 0)))
        x = jnp.pad(x, ((0, pad), (0, 0)))

    out = pl.pallas_call(
        functools.partial(_gated_kernel, alpha),
        out_shape=jax.ShapeDtypeStruct((b_padded, N), h.dtype),
        grid=(grid_b,),
        in_specs=[
            pl.BlockSpec(memory_space=pltpu.MemorySpace.SMEM),    # biases
            pl.BlockSpec((4, N), lambda i: (0, 0)),               # weights (resident)
            pl.BlockSpec((tb, N), lambda i: (i, 0)),              # h stream
            pl.BlockSpec((tb, N), lambda i: (i, 0)),              # x stream
        ],
        out_specs=pl.BlockSpec((tb, N), lambda i: (i, 0)),        # out stream
        compiler_params=pltpu.CompilerParams(
            dimension_semantics=("parallel",)),                   # v7x: 2 TCs
    )(b2, w4, h, x)

    return out[:B] if b_padded != B else out


def _reference(h, x, w_f, b_f, w_u, b_u, alpha=0.1):
    gate = jnp.concatenate([h, x], axis=1)
    f = alpha * jnp.tanh(gate @ w_f.T + b_f)
    u = alpha * jnp.tanh(gate @ w_u.T + b_u)
    return (1.0 + f) * h + (1.0 + u) * x


if __name__ == "__main__":
    # Lane-dense latent size (multiple of 128) and sublane-aligned batch,
    # per the layout feedback, while staying small.
    B, N = 8, 128
    alpha = 0.1

    key = jax.random.PRNGKey(0)
    k_h, k_x, k_wf, k_bf, k_wu, k_bu = jax.random.split(key, 6)

    h = jax.random.normal(k_h, (B, N), dtype=jnp.float32)
    x = jax.random.normal(k_x, (B, N), dtype=jnp.float32)

    # PyTorch-style Linear(2N -> 1) init: uniform +-1/sqrt(fan_in).
    bound = 1.0 / jnp.sqrt(2.0 * N)
    w_f = jax.random.uniform(k_wf, (1, 2 * N), minval=-bound, maxval=bound,
                             dtype=jnp.float32)
    b_f = jax.random.uniform(k_bf, (1,), minval=-bound, maxval=bound,
                             dtype=jnp.float32)
    w_u = jax.random.uniform(k_wu, (1, 2 * N), minval=-bound, maxval=bound,
                             dtype=jnp.float32)
    b_u = jax.random.uniform(k_bu, (1,), minval=-bound, maxval=bound,
                             dtype=jnp.float32)

    out = gated_module(h, x, w_f, b_f, w_u, b_u, alpha=alpha)
    out = jax.block_until_ready(out)

    ref = _reference(h, x, w_f, b_f, w_u, b_u, alpha=alpha)
    assert out.shape == (B, N)
    assert jnp.allclose(out, ref, atol=1e-5, rtol=1e-5), "mismatch vs reference"

    print("KERNEL_OK")
</pallas_src>

<mosaic_0001>
module attributes {stable_mosaic.version = 11 : i64} {
  func.func @_gated_kernel(%arg0: i32, %arg1: memref<2xf32, #tpu.memory_space<smem>>, %arg2: memref<4x128xf32, #tpu.memory_space<vmem>>, %arg3: memref<8x128xf32, #tpu.memory_space<vmem>>, %arg4: memref<8x128xf32, #tpu.memory_space<vmem>>, %arg5: memref<8x128xf32, #tpu.memory_space<vmem>>) attributes {dimension_semantics = [#tpu.dimension_semantics<parallel>], iteration_bounds = array<i64: 1>, scalar_prefetch = 0 : i64, scratch_operands = 0 : i64, tpu.core_type = #tpu.core_type<tc>, window_params = [{transform_indices = @transform_0, window_bounds = array<i64: 2>}, {pipeline_mode = #tpu.pipeline_mode<synchronous>, transform_indices = @transform_1, window_bounds = array<i64: 4, 128>}, {transform_indices = @transform_2, window_bounds = array<i64: 8, 128>}, {transform_indices = @transform_3, window_bounds = array<i64: 8, 128>}, {transform_indices = @transform_4, window_bounds = array<i64: 8, 128>}]} {
    %c0 = arith.constant 0 : index
    %c0_0 = arith.constant 0 : index
    %0 = vector.load %arg3[%c0, %c0_0] : memref<8x128xf32, #tpu.memory_space<vmem>>, vector<8x128xf32>
    %c0_1 = arith.constant 0 : index
    %c0_2 = arith.constant 0 : index
    %1 = vector.load %arg4[%c0_1, %c0_2] : memref<8x128xf32, #tpu.memory_space<vmem>>, vector<8x128xf32>
    %c0_3 = arith.constant 0 : index
    %c0_4 = arith.constant 0 : index
    %2 = vector.load %arg2[%c0_3, %c0_4] : memref<4x128xf32, #tpu.memory_space<vmem>>, vector<1x128xf32>
    %c1 = arith.constant 1 : index
    %c0_5 = arith.constant 0 : index
    %3 = vector.load %arg2[%c1, %c0_5] : memref<4x128xf32, #tpu.memory_space<vmem>>, vector<1x128xf32>
    %c2 = arith.constant 2 : index
    %c0_6 = arith.constant 0 : index
    %4 = vector.load %arg2[%c2, %c0_6] : memref<4x128xf32, #tpu.memory_space<vmem>>, vector<1x128xf32>
    %c3 = arith.constant 3 : index
    %c0_7 = arith.constant 0 : index
    %5 = vector.load %arg2[%c3, %c0_7] : memref<4x128xf32, #tpu.memory_space<vmem>>, vector<1x128xf32>
    %6 = vector.broadcast %2 : vector<1x128xf32> to vector<8x128xf32>
    %7 = arith.mulf %0, %6 : vector<8x128xf32>
    %8 = vector.broadcast %3 : vector<1x128xf32> to vector<8x128xf32>
    %9 = arith.mulf %1, %8 : vector<8x128xf32>
    %10 = arith.addf %7, %9 : vector<8x128xf32>
    %cst = arith.constant dense<0.000000e+00> : vector<8xf32>
    %11 = vector.multi_reduction <add>, %10, %cst [1] : vector<8x128xf32> to vector<8xf32>
    %12 = vector.shape_cast %11 : vector<8xf32> to vector<8x1xf32>
    %c0_8 = arith.constant 0 : index
    %13 = memref.load %arg1[%c0_8] : memref<2xf32, #tpu.memory_space<smem>>
    %14 = vector.broadcast %13 : f32 to vector<8x1xf32>
    %15 = arith.addf %12, %14 : vector<8x1xf32>
    %16 = vector.broadcast %4 : vector<1x128xf32> to vector<8x128xf32>
    %17 = arith.mulf %0, %16 : vector<8x128xf32>
    %18 = vector.broadcast %5 : vector<1x128xf32> to vector<8x128xf32>
    %19 = arith.mulf %1, %18 : vector<8x128xf32>
    %20 = arith.addf %17, %19 : vector<8x128xf32>
    %cst_9 = arith.constant dense<0.000000e+00> : vector<8xf32>
    %21 = vector.multi_reduction <add>, %20, %cst_9 [1] : vector<8x128xf32> to vector<8xf32>
    %22 = vector.shape_cast %21 : vector<8xf32> to vector<8x1xf32>
    %c1_10 = arith.constant 1 : index
    %23 = memref.load %arg1[%c1_10] : memref<2xf32, #tpu.memory_space<smem>>
    %24 = vector.broadcast %23 : f32 to vector<8x1xf32>
    %25 = arith.addf %22, %24 : vector<8x1xf32>
    %26 = math.tanh %15 : vector<8x1xf32>
    %cst_11 = arith.constant 1.000000e-01 : f32
    %27 = vector.broadcast %cst_11 : f32 to vector<8x1xf32>
    %28 = arith.mulf %27, %26 : vector<8x1xf32>
    %29 = math.tanh %25 : vector<8x1xf32>
    %cst_12 = arith.constant 1.000000e-01 : f32
    %30 = vector.broadcast %cst_12 : f32 to vector<8x1xf32>
    %31 = arith.mulf %30, %29 : vector<8x1xf32>
    %cst_13 = arith.constant 1.000000e+00 : f32
    %32 = vector.broadcast %cst_13 : f32 to vector<8x1xf32>
    %33 = arith.addf %32, %28 : vector<8x1xf32>
    %34 = vector.broadcast %33 : vector<8x1xf32> to vector<8x128xf32>
    %35 = arith.mulf %34, %0 : vector<8x128xf32>
    %cst_14 = arith.constant 1.000000e+00 : f32
    %36 = vector.broadcast %cst_14 : f32 to vector<8x1xf32>
    %37 = arith.addf %36, %31 : vector<8x1xf32>
    %38 = vector.broadcast %37 : vector<8x1xf32> to vector<8x128xf32>
    %39 = arith.mulf %38, %1 : vector<8x128xf32>
    %40 = arith.addf %35, %39 : vector<8x128xf32>
    %c0_15 = arith.constant 0 : index
    %c0_16 = arith.constant 0 : index
    %41 = vector.load %arg5[%c0_15, %c0_16] : memref<8x128xf32, #tpu.memory_space<vmem>>, vector<8x128xf32>
    tpu.vector_store %arg5[%c0_15, %c0_16], %40 {strides = array<i32>} : memref<8x128xf32, #tpu.memory_space<vmem>>, vector<8x128xf32>,
    return
  }
  func.func @transform_0(%arg0: i32) -> i32 {
    %c0_i32 = arith.constant 0 : i32
    %c0_i32_0 = arith.constant 0 : i32
    return %c0_i32 : i32
  }
  func.func @transform_1(%arg0: i32) -> (i32, i32) {
    %c0_i32 = arith.constant 0 : i32
    %c0_i32_0 = arith.constant 0 : i32
    %c0_i32_1 = arith.constant 0 : i32
    return %c0_i32, %c0_i32_0 : i32, i32
  }
  func.func @transform_2(%arg0: i32) -> (i32, i32) {
    %c0_i32 = arith.constant 0 : i32
    %c0_i32_0 = arith.constant 0 : i32
    return %arg0, %c0_i32 : i32, i32
  }
  func.func @transform_3(%arg0: i32) -> (i32, i32) {
    %c0_i32 = arith.constant 0 : i32
    %c0_i32_0 = arith.constant 0 : i32
    return %arg0, %c0_i32 : i32, i32
  }
  func.func @transform_4(%arg0: i32) -> (i32, i32) {
    %c0_i32 = arith.constant 0 : i32
    %c0_i32_0 = arith.constant 0 : i32
    return %arg0, %c0_i32 : i32, i32
  }
}

</mosaic_0001>

<bundles_post_ra>
// kernel: tpu_custom_call.1
= control target key start
LH: loop header
LB: loop body
LE: loop exit
PB: predicated region body
PF: predicated region fallthrough
CT: control target
= control target key end

     0   :  { %9 = vsyncpa [#allocation5], 0  ;;  %s302_s0 = inlined_call_operand.hbm [shape: f32[2], index: 0, kind: input, shape index: {}]   ;;  %s303_s1 = inlined_call_operand.hbm [shape: f32[4,128], index: 1, kind: input, shape index: {}]   ;;  %s304_s2 = inlined_call_operand.hbm [shape: f32[8,128], index: 2, kind: input, shape index: {}]   ;;  %s305_s3 = inlined_call_operand.hbm [shape: f32[8,128], index: 3, kind: input, shape index: {}]   ;;  %s306_s4 = inlined_call_operand.hbm [shape: f32[8,128], index: 4, kind: output, shape index: {}]  }
   0x1   :  { %10 = vsyncpa [#allocation3], 0 }
   0x2   :  { %11 = vsyncpa [#allocation8], 0  ;;  %s38_s17 = sshll.u32 %s304_s2, 4  ;;  %s39_s17 = int_to_ptr.hbm [resolvable:$true] %s38_s17 }
   0x3   :  { %12 = vsyncpa [#allocation4], 0  ;;  %s257_s18 = smov [#allocation7]   ;;  %s18_s22 = sshll.u32 %s302_s0, 4  ;;  %s19_s22 = int_to_ptr.hbm [resolvable:$true] %s18_s22 }
   0x4   :  { %s40_s19 = sshll.u32 %s257_s18, 4  ;;  %s258_s23 = smov [#allocation2]   ;;  %s41_s19 = int_to_ptr.vmem [resolvable:$true] %s40_s19 }
   0x5   :  { %43 = dma.hbm_to_vmem [thread:$0]  %s39_s17, 128, %s41_s19, [#allocation8]  }
   0x6   :  { %21 = dma.hbm_to_smem %s19_s22, 16, %s258_s23, [#allocation5]  }
   0x7   :  { %s27_s26 = sshll.u32 %s303_s1, 4  ;;  %s259_s27 = smov [#allocation6]   ;;  %s28_s26 = int_to_ptr.hbm [resolvable:$true] %s27_s26 }
   0x8   :  { %s29_s2 = sshll.u32 %s259_s27, 4  ;;  %s49_s30 = sshll.u32 %s305_s3, 4  ;;  %s30_s2 = int_to_ptr.vmem [resolvable:$true] %s29_s2  ;;  %s50_s30 = int_to_ptr.hbm [resolvable:$true] %s49_s30 }
   0x9   :  { %32 = dma.hbm_to_vmem [thread:$0]  %s28_s26, 64, %s30_s2, [#allocation3]  }
   0xa   :  { %s260_s5 = smov [#allocation9]  }
   0xb   :  { %s51_s0 = sshll.u32 %s260_s5, 4  ;;  %s52_s0 = int_to_ptr.vmem [resolvable:$true] %s51_s0 }
   0xc   :  { %54 = dma.hbm_to_vmem [thread:$0]  %s50_s30, 128, %s52_s0, [#allocation8]  }
   0xd   :  { %249 = dma.done.wait [#allocation5], 16  }
   0xe   :  { %250 = vsyncadd [#allocation5], 4294967280 }
   0xf   :  { %251 = dma.done.wait [#allocation3], 64  }
  0x10   :  { %252 = vsyncadd [#allocation3], 4294967232 }
  0x11   :  { %253 = dma.done.wait [#allocation8], 256  }
  0x12   :  { %254 = vsyncadd [#allocation8], 4294967040 }
  0x13   :  { %71 = sfence }
  0x14   :  { %v72_v0 = vld [vmem:[#allocation7] sm:$0xff]  ;;  %v73_v1 = vld [vmem:[#allocation9] sm:$0xff]  ;;  %v133_v2 = vld [vmem:[#allocation6] ss:$0 sm:$0xff]  ;;  %s85_s1 = sld [smem:[#allocation2]]  ;;  %s261_s6 = smov [#allocation10]  }
  0x15   :  { %v134_v3 = vld [vmem:[#allocation6 + $0x1] ss:$0 sm:$0xff]  ;;  %v79_v4 = vmul.f32 %v133_v2, %v72_v0  ;;  %v135_v6 = vld [vmem:[#allocation6 + $0x2] ss:$0 sm:$0xff]  ;;  %v136_v7 = vld [vmem:[#allocation6 + $0x3] ss:$0 sm:$0xff] }
  0x16   :  { %v81_v5 = vmul.f32 %v134_v3, %v73_v1  ;;  %v89_v9 = vmul.f32 %v135_v6, %v72_v0  ;;  %v91_v10 = vmul.f32 %v136_v7, %v73_v1  ;;  %s127_s3 = sld [smem:[#allocation2 + $0x1]]  ;;  %s113_s7 = sshll.u32 %s261_s6, 4  ;;  %s114_s7 = int_to_ptr.vmem [resolvable:$true] %s113_s7 }
  0x17   :  { %s115_s10 = sshll.u32 %s306_s4, 4  ;;  %s116_s10 = int_to_ptr.hbm [resolvable:$true] %s115_s10 }
  0x18   :  { %v82_v8 = vadd.f32 %v81_v5, %v79_v4  ;;  %v92_v11 = vadd.f32 %v91_v10, %v89_v9 }
  0x1a   :  { %83 = vadd.xlane.f32.xlu0 %v82_v8  ;;  %v86_v12 = vstv %s85_s1 }
  0x1c   :  { %v96_v15 = vstv %s127_s3 }
  0x22   :  { %93 = vadd.xlane.f32.xlu0 %v92_v11 }
  0x8d   :  { %v84_v13 = vpop.xlane.xlu0 %83 }
  0x8e   :  { %v87_v14 = vadd.f32 %v86_v12, %v84_v13 }
  0x90   :  { %137 = vtanh.f32 %v87_v14 }
  0x95   :  { %v94_v16 = vpop.xlane.xlu0 %93 }
  0x96   :  { %v97_v17 = vadd.f32 %v96_v15, %v94_v16  ;;  %v138_v18 = vpop.eup %137 }
  0x97   :  { %v99_v19 = vmul.f32 0.1, %v138_v18 }
  0x98   :  { %139 = vtanh.f32 %v97_v17 }
  0x99   :  { %v102_v21 = vadd.f32 1.0, %v99_v19 }
  0x9b   :  { %v103_v24 = vmul.f32 %v102_v21, %v72_v0 }
  0x9e   :  { %v140_v20 = vpop.eup %139 }
  0x9f   :  { %v101_v22 = vmul.f32 0.1, %v140_v20 }
  0xa1   :  { %v104_v23 = vadd.f32 1.0, %v101_v22 }
  0xa3   :  { %v105_v25 = vmul.f32 %v104_v23, %v73_v1 }
  0xa5   :  { %v106_v26 = vadd.f32 %v105_v25, %v103_v24 }
  0xa7   :  { %107 = vst [vmem:[#allocation10] sm:$0xff] %v106_v26 }
  0xa8   :  { %118 = dma.vmem_to_hbm [thread:$0]  %s114_s7, 128, %s116_s10, [#allocation4]  }
  0xa9   :  { %255 = dma.done.wait [#allocation4], 128  }
  0xaa   :  { %256 = vsyncadd [#allocation4], 4294967168 }
  0xab   :  { %123 = vsyncpa [#allocation3], 1 }
  0xac   :  { %124 = vsyncpa [#allocation8], 1 }
  0xad   :  { %125 = vsyncpa [#allocation4], 1 }
  0xae   :  { %126 = vsyncpa [#allocation5], 1 }

</bundles_post_ra>
